<compile_context>
chip_gen: v7x
topology: tpu7x:2x2x1
jax: 0.10.0
libtpu: 0.0.40
codegen_flags: <defaults>
</compile_context>

<pallas_src>
import numpy as np
import jax
import jax.numpy as jnp
from jax.experimental import pallas as pl
from jax.experimental.pallas import tpu as pltpu


def _cdiv(a, b):
    return -(-a // b)


# ----------------------------------------------------------------------------------
# Kernel: one (batch-row block, time tile) per grid step.
#   x_ref : (BN, C, TL)   input tile, channels on sublanes, time on lanes
#   w_ref : (O, C)        1x1 conv weight (resident in VMEM across all steps)
#   b_ref : (O, 1)        bias, f32, lane-broadcast
#   o_ref : (BN, O, TL)   output tile (the size-1 "unsqueeze" dim is squeezed away)
# ----------------------------------------------------------------------------------
def _wavestart_kernel(x_ref, w_ref, b_ref, o_ref):
    w = w_ref[...]
    b = b_ref[...]
    # BN is a small static block size (<= 8): unrolled jnp.dot per row avoids the
    # cross-sublane transposes a batched einsum would introduce.
    for i in range(x_ref.shape[0]):
        y = jnp.dot(w, x_ref[i], preferred_element_type=jnp.float32)  # (O, TL)
        o_ref[i] = (y + b).astype(o_ref.dtype)


def _choose_tiles(N, C, O, L, itemsize):
    """Pick (BN, TL).

    TL: multiple of 128 (or full L when L < 128), capped so that double-buffered
        input+output blocks stay under ~8 MiB -> safe on v5e (16 MiB default scoped
        VMEM), v6e and v7x (32 MiB default) with full pipelining.
    BN: when the time axis fits in a single tile, batch rows to amortize the ~0.35 us
        per-grid-step overhead, but keep >= 2 grid steps when N > 1 so both v7x
        TensorCores get work.
    """
    budget = 8 * 1024 * 1024

    if L < 128:
        TL = L                                  # full time axis (only legal sub-128 block)
    else:
        TL = min(2048, 128 * (L // 128))        # lane-dense tile; cdiv grid masks the tail
        while TL > 128 and 2 * (C + O) * TL * itemsize > budget:
            TL -= 128

    BN = 1
    if _cdiv(L, TL) == 1 and N > 1:
        BN = min(8, _cdiv(N, 2))
        while BN > 1 and 2 * BN * (C + O) * TL * itemsize > budget:
            BN -= 1
    return BN, TL


def wavestart_forward(x, weight, bias):
    """WaveStart.forward.

    x:      (N, C, L)  PyTorch Conv1d input layout
    weight: (O, C, 1)  PyTorch Conv1d weight (kernel_size = 1)
    bias:   (O,)       PyTorch Conv1d bias
    returns (y, 0) with y of shape (N, 1, O, L)  == conv(x).unsqueeze(-3)
    """
    N, C, L = x.shape
    O = weight.shape[0]
    w = weight[:, :, 0].astype(x.dtype)            # (O, C)  -- MXU operand dtype
    b = bias.reshape(O, 1).astype(jnp.float32)     # (O, 1)  -- added in f32 in-kernel

    itemsize = jnp.dtype(x.dtype).itemsize
    BN, TL = _choose_tiles(N, C, O, L, itemsize)
    grid = (_cdiv(N, BN), _cdiv(L, TL))

    cost = pl.CostEstimate(
        flops=2 * N * O * C * L,
        bytes_accessed=(N * C * L + N * O * L) * itemsize + O * C * itemsize + O * 4,
        transcendentals=0,
    )

    y = pl.pallas_call(
        _wavestart_kernel,
        out_shape=jax.ShapeDtypeStruct((N, 1, O, L), x.dtype),
        grid=grid,
        in_specs=[
            pl.BlockSpec((BN, C, TL), lambda n, l: (n, 0, l)),
            pl.BlockSpec((O, C), lambda n, l: (0, 0)),
            pl.BlockSpec((O, 1), lambda n, l: (0, 0)),
        ],
        # Emit the unsqueeze(-3) directly: size-1 dim is squeezed out of the kernel view.
        out_specs=pl.BlockSpec((BN, None, O, TL), lambda n, l: (n, 0, 0, l)),
        compiler_params=pltpu.CompilerParams(
            dimension_semantics=("parallel", "parallel")),
        cost_estimate=cost,
    )(x, w, b)

    # The constant initial skip accumulator (int 0) is pure glue, not compute.
    return y, 0


# ----------------------------------------------------------------------------------
# Pure-numpy reference (mirrors the PyTorch module exactly) for validation
# ----------------------------------------------------------------------------------
def ref_forward(x, weight, bias):
    x = np.asarray(x, np.float32)
    W = np.asarray(weight, np.float32)[:, :, 0]          # (O, C)
    b = np.asarray(bias, np.float32)
    y = np.einsum('ncl,oc->nol', x, W) + b[None, :, None]
    return y[:, None, :, :], 0


# ----------------------------------------------------------------------------------
if __name__ == "__main__":
    key = jax.random.PRNGKey(0)

    # (N, C, O, L): primary small config + row-batched path (ragged N block)
    # + ragged time axis (masked last tile).
    configs = [
        (2, 4, 32, 16),
        (5, 4, 32, 16),
        (3, 4, 32, 200),
    ]

    for (N, C, O, L) in configs:
        key, k_w, k_b, k_x = jax.random.split(key, 4)
        scale = 0.1
        weight = scale * jax.random.normal(k_w, (O, C, 1), jnp.float32)
        bias = scale * jax.random.normal(k_b, (O,), jnp.float32)
        x = jax.random.normal(k_x, (N, C, L), jnp.float32)

        y, skip0 = wavestart_forward(x, weight, bias)
        y = jax.block_until_ready(y)

        y_ref, skip_ref = ref_forward(np.asarray(x), np.asarray(weight), np.asarray(bias))
        assert y.shape == (N, 1, O, L), (y.shape, (N, 1, O, L))
        assert skip0 == 0 and skip_ref == 0
        np.testing.assert_allclose(np.asarray(y), y_ref, rtol=1e-2, atol=1e-2)

    print("KERNEL_OK")
</pallas_src>

<mosaic_0001>
module attributes {stable_mosaic.version = 11 : i64} {
  func.func @_wavestart_kernel(%arg0: i32, %arg1: i32, %arg2: memref<1x4x16xf32, #tpu.memory_space<vmem>>, %arg3: memref<32x4xf32, #tpu.memory_space<vmem>>, %arg4: memref<32x1xf32, #tpu.memory_space<vmem>>, %arg5: memref<1x1x32x16xf32, #tpu.memory_space<vmem>>) attributes {dimension_semantics = [#tpu.dimension_semantics<parallel>, #tpu.dimension_semantics<parallel>], iteration_bounds = array<i64: 2, 1>, scalar_prefetch = 0 : i64, scratch_operands = 0 : i64, tpu.core_type = #tpu.core_type<tc>, window_params = [{transform_indices = @transform_0, window_bounds = array<i64: 1, 4, 16>}, {pipeline_mode = #tpu.pipeline_mode<synchronous>, transform_indices = @transform_1, window_bounds = array<i64: 32, 4>}, {pipeline_mode = #tpu.pipeline_mode<synchronous>, transform_indices = @transform_2, window_bounds = array<i64: 32, 1>}, {transform_indices = @transform_3, window_bounds = array<i64: 1, 1, 32, 16>}]} {
    %c0 = arith.constant 0 : index
    %c0_0 = arith.constant 0 : index
    %0 = vector.load %arg3[%c0, %c0_0] : memref<32x4xf32, #tpu.memory_space<vmem>>, vector<32x4xf32>
    %c0_1 = arith.constant 0 : index
    %c0_2 = arith.constant 0 : index
    %1 = vector.load %arg4[%c0_1, %c0_2] : memref<32x1xf32, #tpu.memory_space<vmem>>, vector<32x1xf32>
    %c0_3 = arith.constant 0 : index
    %c0_4 = arith.constant 0 : index
    %c0_5 = arith.constant 0 : index
    %2 = vector.load %arg2[%c0_3, %c0_4, %c0_5] : memref<1x4x16xf32, #tpu.memory_space<vmem>>, vector<1x4x16xf32>
    %3 = vector.shape_cast %2 : vector<1x4x16xf32> to vector<4x16xf32>
    %cst = arith.constant dense<0.000000e+00> : vector<32x16xf32>
    %4 = tpu.matmul %0, %3, %cst {dimension_numbers = #tpu.dot_dimension_numbers<[1], [0], [0], [1], [0, 0, 1, 1], [], []>} : vector<32x4xf32>, vector<4x16xf32>, vector<32x16xf32> -> vector<32x16xf32>
    %5 = vector.broadcast %1 : vector<32x1xf32> to vector<32x16xf32>
    %6 = arith.addf %4, %5 : vector<32x16xf32>
    %c0_6 = arith.constant 0 : index
    %c0_7 = arith.constant 0 : index
    %c0_8 = arith.constant 0 : index
    %c0_9 = arith.constant 0 : index
    %7 = vector.load %arg5[%c0_6, %c0_7, %c0_8, %c0_9] : memref<1x1x32x16xf32, #tpu.memory_space<vmem>>, vector<1x1x32x16xf32>
    %8 = vector.shape_cast %7 : vector<1x1x32x16xf32> to vector<32x16xf32>
    %9 = vector.shape_cast %6 : vector<32x16xf32> to vector<1x1x32x16xf32>
    tpu.vector_store %arg5[%c0_6, %c0_7, %c0_8, %c0_9], %9 {strides = array<i32>} : memref<1x1x32x16xf32, #tpu.memory_space<vmem>>, vector<1x1x32x16xf32>,
    return
  }
  func.func @transform_0(%arg0: i32, %arg1: i32) -> (i32, i32, i32) {
    %c0_i32 = arith.constant 0 : i32
    %c0_i32_0 = arith.constant 0 : i32
    return %arg0, %c0_i32, %arg1 : i32, i32, i32
  }
  func.func @transform_1(%arg0: i32, %arg1: i32) -> (i32, i32) {
    %c0_i32 = arith.constant 0 : i32
    %c0_i32_0 = arith.constant 0 : i32
    %c0_i32_1 = arith.constant 0 : i32
    return %c0_i32, %c0_i32_0 : i32, i32
  }
  func.func @transform_2(%arg0: i32, %arg1: i32) -> (i32, i32) {
    %c0_i32 = arith.constant 0 : i32
    %c0_i32_0 = arith.constant 0 : i32
    %c0_i32_1 = arith.constant 0 : i32
    return %c0_i32, %c0_i32_0 : i32, i32
  }
  func.func @transform_3(%arg0: i32, %arg1: i32) -> (i32, i32, i32, i32) {
    %c0_i32 = arith.constant 0 : i32
    %c0_i32_0 = arith.constant 0 : i32
    %c0_i32_1 = arith.constant 0 : i32
    return %arg0, %c0_i32, %c0_i32_0, %arg1 : i32, i32, i32, i32
  }
}

</mosaic_0001>

<bundles_post_ra>
// kernel: tpu_custom_call.1
= control target key start
LH: loop header
LB: loop body
LE: loop exit
PB: predicated region body
PF: predicated region fallthrough
CT: control target
= control target key end

     0   :  { %s518_s12 = smov 0   ;;  %s520_s13 = smov 0   ;;  %s579_s0 = inlined_call_operand.vmem [shape: f32[2,4,16], index: 0, kind: input, shape index: {}]   ;;  %s580_s1 = inlined_call_operand.vmem [shape: f32[32,4], index: 1, kind: input, shape index: {}]   ;;  %s581_s2 = inlined_call_operand.vmem [shape: f32[32,1], index: 2, kind: input, shape index: {}]   ;;  %s582_s3 = inlined_call_operand.vmem [shape: f32[2,1,32,16], index: 3, kind: output, shape index: {}]  }
   0x1   :  { %s522_s14 = smov 0  }
   0x2 LB: > { %s25_s15 = sadd.s32 1, %s491_s13  ;;  %p419_p0 = scmp.ge.s32.totalorder %s495_s14, 1  ;;  %s495_s14 = sphi %s522_s14, %s13_s14   ;;  %s491_s13 = sphi %s520_s13, %s584_s13   ;;  %s487_s12 = sphi %s518_s12, %s583_s12  }
   0x3   : > { %p27_p1 = scmp.ge.s32.totalorder %s25_s15, 2  ;;  %p155_p2 = scmp.lt.s32.totalorder %s495_s14, 3 }
   0x5   : > { %s586_s15 = smov (%p27_p1, %s25_s15), 0  ;;  %p156_p3 = pnand %p419_p0, %p155_p2 }
   0x6   : > { %p184_p4 = scmp.lt.s32.totalorder (!%p156_p3), %s487_s12, 1  ;;  %v199_v0 = vld [vmem:[%s580_s1] sm:$0xff] (!%p156_p3)  ;;  %vm228_vm0 = vcmask (!%p156_p3), 31744   ;;  %v201_v1 = vld [vmem:[%s580_s1 + $0x10] sm:$0xff] (!%p156_p3)  ;;  %v497_v4 = vmov (!%p156_p3), 0   ;;  %vm241_vm1 = vcmask (!%p156_p3), 1043456  }
   0x7   : > { %159 = sbr.rel (%p156_p3) target bundleno = 236 (0xec), region = 32  ;;  %438 = vmatprep.mubr.msk.f32.mxu0 (!%p156_p3), %vm228_vm0, %v199_v0  ;;  %441 = vmatprep.mubr.msk.f32.mxu1 (!%p156_p3), %vm228_vm0, %v201_v1  ;;  %v205_v2 = vld [vmem:[%s581_s2 + $0x10] sm:$0xff] (!%p156_p3)  ;;  %v203_v3 = vld [vmem:[%s581_s2] sm:$0xff] (!%p156_p3)  ;;  %v200_v6 = vld [vmem:[%s580_s1 + $0x8] sm:$0xff] (!%p156_p3)  ;;  %vm330_vm2 = vcmask (!%p156_p3), 130048  }
   0x8   : > { %472 = vset.pattern.permute.xlu1 (!%p156_p3), %v497_v4  ;;  %471 = vset.pattern.permute.xlu0 (!%p156_p3), %v497_v4  ;;  %v202_v7 = vld [vmem:[%s580_s1 + $0x18] sm:$0xff] (!%p156_p3)  ;;  %v204_v9 = vld [vmem:[%s581_s2 + $0x8] sm:$0xff] (!%p156_p3) }
   0x9   : > { %220 = vperm.xlu1 (!%p156_p3), %472, %v205_v2   ;;  %210 = vperm.xlu0 (!%p156_p3), %471, %v203_v3   ;;  %v206_v8 = vld [vmem:[%s581_s2 + $0x18] sm:$0xff] (!%p156_p3) }
   0xd   : > { %225 = vperm.xlu1 (!%p156_p3), %472, %v206_v8   ;;  %215 = vperm.xlu0 (!%p156_p3), %471, %v204_v9  }
   0xe   : > { %s588_s12 = smov (!%p184_p4, %s487_s12), 1 }
   0xf   : > { %s420_s24 = sshll.u32 %s588_s12, 2  ;;  %s430_s9 = sshll.u32 %s588_s12, 5 }
  0x10   : > { %s190_s27 = scalar_lea.vmem %s579_s0, %s420_s24  ;;  %s198_s16 = scalar_lea.vmem %s582_s3, %s430_s9 }
  0x11   : > { %v207_v5 = vld [vmem:[%s190_s27] sm:$0xf] }
  0x12   : > { %436 = vmatprep.subr.msk.mxu0 %vm241_vm1, %v207_v5  ;;  %444 = vmatprep.subr.msk.mxu1 %vm241_vm1, %v207_v5 }
  0x13   : > { %437 = vmatpush3.msk.msra.mxu0 %vm241_vm1, %v207_v5  ;;  %445 = vmatpush3.msk.msra.mxu1 %vm241_vm1, %v207_v5 }
  0x14   : > { %439 = vmatmul.mubr.msk.f32.vlgmr.msra.gmra.mrb[0].mxu0 %vm228_vm0, %v200_v6  ;;  %442 = vmatmul.mubr.msk.f32.vlgmr.msra.gmra.mrb[0].mxu1 %vm228_vm0, %v202_v7 }
  0x88   : > { %v221_v10 = vpop.permute.xlu1 %220  ;;  %v211_v11 = vpop.permute.xlu0 %210 }
  0x8c   : > { %v226_v12 = vpop.permute.xlu1 %225  ;;  %v216_v13 = vpop.permute.xlu0 %215 }
  0xe7   : > { %v440_v14 = vpop.f32.mrb[0].mxu0  ;;  %v443_v15 = vpop.f32.mrb[0].mxu1 }
  0xe8   : > { %v317_v16 = vadd.f32 %v440_v14, %v216_v13  ;;  %v327_v17 = vadd.f32 %v443_v15, %v226_v12  ;;  %v311_v18 = vpop.f32.mrb[1].mxu0  ;;  %v321_v19 = vpop.f32.mrb[1].mxu1 }
  0xe9   : > { %v312_v20 = vadd.f32 %v311_v18, %v211_v11  ;;  %v322_v21 = vadd.f32 %v321_v19, %v221_v10 }
  0xea   : > { %332 = vst.msk [vmem:[%s198_s16 + $0x8] sm:$0xff] %vm330_vm2, %v317_v16  ;;  %334 = vst.msk [vmem:[%s198_s16 + $0x18] sm:$0xff] %vm330_vm2, %v327_v17 }
  0xeb   : > { %331 = vst.msk [vmem:[%s198_s16] sm:$0xff] %vm330_vm2, %v312_v20  ;;  %333 = vst.msk [vmem:[%s198_s16 + $0x10] sm:$0xff] %vm330_vm2, %v322_v21 }
  0xec PF: > { %s13_s14 = sadd.s32 1, %s495_s14   ;;  %s583_s12 = smov %s491_s13 }
  0xed   : > { %p10_p5 = scmp.ge.s32.totalorder %s13_s14, 4   ;;  %s584_s13 = smov %s586_s15 }
  0xef   :  { %12 = sbr.rel (!%p10_p5) target bundleno = 2 (0x2), region = 62 }

</bundles_post_ra>
